<compile_context>
chip_gen: v5e
topology: v5e:2x2
jax: 0.10.0
libtpu: 0.0.40
codegen_flags: <defaults>
</compile_context>

<pallas_src>
import functools

import jax
import jax.numpy as jnp
from jax.experimental import pallas as pl
from jax.experimental.pallas import tpu as pltpu


def _round_up(x: int, m: int) -> int:
    return ((x + m - 1) // m) * m


def _sublane_multiple(dtype) -> int:
    # Sub-32-bit dtypes pack along sublanes: bf16 -> 16 rows/vreg, int8/fp8 -> 32.
    itemsize = jnp.dtype(dtype).itemsize
    return max(8, 32 // max(1, itemsize))


def _rmsnorm_kernel(x_ref, w_ref, o_ref, *, eps):
    # x_ref: [TM, D] (any float dtype), w_ref: [1, D] f32, o_ref: [TM, D] f32
    x = x_ref[...].astype(jnp.float32)                      # matches torch x.float()
    mean_sq = jnp.mean(x * x, axis=-1, keepdims=True)       # [TM, 1]
    norm = jnp.sqrt(mean_sq) + eps                          # eps outside sqrt (spec)
    # Exact reciprocal of the per-row scalar, then a cheap VPU multiply; keeps the
    # [TM, D] vector divide off the VALU critical path.
    r = pl.reciprocal(norm, approx=False)                   # [TM, 1]
    o_ref[...] = (x * r) * w_ref[...]


def gemma_rmsnorm(x, weight, eps: float = 1e-5, *,
                  block_rows: int = 1024,
                  vmem_tile_budget_bytes: int = 16 * 1024 * 1024,
                  min_grid_steps: int = 8):
    """y = (x.float() / (sqrt(mean(x.float()**2, -1, keepdim)) + eps)) * weight.

    Returns float32 (same as the PyTorch module). Works for any leading shape; the
    last dim must equal weight.shape[0].
    """
    orig_shape = x.shape
    D = orig_shape[-1]
    assert weight.shape == (D,)
    x2d = x.reshape(-1, D)
    M = x2d.shape[0]

    in_bytes = jnp.dtype(x2d.dtype).itemsize
    sub = _sublane_multiple(x2d.dtype)

    # Per-row VMEM bytes: double-buffered input tile (2*in_bytes) + double-buffered f32
    # output tile (2*4) + in-kernel f32 upcast/product temporaries (~2*4).
    bytes_per_row = (2 * in_bytes + 2 * 4 + 2 * 4) * D
    tm_cap = max(sub, (vmem_tile_budget_bytes // bytes_per_row) // sub * sub)

    # Keep at least ~min_grid_steps grid steps (when M allows) so v7x's two TensorCores
    # both get work and the 2-deep pipeline can overlap DMA with compute.
    tm_steps = max(sub, _round_up(pl.cdiv(M, min_grid_steps), sub))

    TM = min(block_rows, tm_cap, tm_steps)
    TM = max(sub, (TM // sub) * sub)

    grid = (pl.cdiv(M, TM),)   # partial last block: OOB rows are masked on store
    w2d = weight.reshape(1, D).astype(jnp.float32)

    cost = pl.CostEstimate(
        flops=3 * M * D,
        transcendentals=2 * M,                         # sqrt + reciprocal per row
        bytes_accessed=M * D * in_bytes + M * D * 4 + D * 4,
    )

    out = pl.pallas_call(
        functools.partial(_rmsnorm_kernel, eps=eps),
        out_shape=jax.ShapeDtypeStruct((M, D), jnp.float32),
        grid=grid,
        in_specs=[
            pl.BlockSpec((TM, D), lambda i: (i, 0)),   # activation rows, pipelined
            pl.BlockSpec((1, D), lambda i: (0, 0)),    # weight, resident across steps
        ],
        out_specs=pl.BlockSpec((TM, D), lambda i: (i, 0)),
        compiler_params=pltpu.CompilerParams(
            dimension_semantics=("parallel",),          # rows independent -> megacore
            vmem_limit_bytes=32 * 1024 * 1024,
        ),
        cost_estimate=cost,
    )(x2d, w2d)

    return out.reshape(orig_shape)


# Pure-JAX reference with identical semantics (for validation only).
def _rmsnorm_ref(x, weight, eps):
    xf = x.astype(jnp.float32)
    norm = jnp.sqrt(jnp.mean(xf * xf, axis=-1, keepdims=True)) + eps
    return (xf / norm) * weight.astype(jnp.float32)


if __name__ == "__main__":
    key = jax.random.PRNGKey(0)
    k1, k2, k3, k4 = jax.random.split(key, 4)
    eps = 1e-5

    # Small shape consistent with the module: batch=2, seq=8, d_model=32.
    B, S, D = 2, 8, 32
    x = jax.random.normal(k1, (B, S, D), dtype=jnp.float32)
    w = 1.0 + 0.1 * jax.random.normal(k2, (D,), dtype=jnp.float32)

    y = jax.block_until_ready(gemma_rmsnorm(x, w, eps))
    ref = _rmsnorm_ref(x, w, eps)
    assert y.shape == (B, S, D) and y.dtype == jnp.float32
    assert bool(jnp.all(jnp.isfinite(y)))
    assert bool(jnp.allclose(y, ref, rtol=1e-5, atol=1e-5))

    # Second case: bf16 input, rows NOT a multiple of the tile -> exercises the
    # multi-step pipelined grid and the masked partial last block (no host-side pad).
    B2, S2, D2 = 4, 37, 256
    x2 = jax.random.normal(k3, (B2, S2, D2), dtype=jnp.bfloat16)
    w2 = 1.0 + 0.1 * jax.random.normal(k4, (D2,), dtype=jnp.float32)

    y2 = jax.block_until_ready(gemma_rmsnorm(x2, w2, eps, block_rows=64))
    ref2 = _rmsnorm_ref(x2, w2, eps)
    assert y2.shape == (B2, S2, D2) and y2.dtype == jnp.float32
    assert bool(jnp.all(jnp.isfinite(y2)))
    assert bool(jnp.allclose(y2, ref2, rtol=1e-3, atol=1e-3))  # bf16 input tolerance

    print("KERNEL_OK")
</pallas_src>

<mosaic_0001>
module attributes {stable_mosaic.version = 11 : i64} {
  func.func @_rmsnorm_kernel(%arg0: i32, %arg1: memref<8x32xf32, #tpu.memory_space<vmem>>, %arg2: memref<1x32xf32, #tpu.memory_space<vmem>>, %arg3: memref<8x32xf32, #tpu.memory_space<vmem>>) attributes {dimension_semantics = [#tpu.dimension_semantics<parallel>], iteration_bounds = array<i64: 2>, scalar_prefetch = 0 : i64, scratch_operands = 0 : i64, tpu.core_type = #tpu.core_type<tc>, window_params = [{transform_indices = @transform_0, window_bounds = array<i64: 8, 32>}, {pipeline_mode = #tpu.pipeline_mode<synchronous>, transform_indices = @transform_1, window_bounds = array<i64: 1, 32>}, {transform_indices = @transform_2, window_bounds = array<i64: 8, 32>}]} {
    %c0 = arith.constant 0 : index
    %c0_0 = arith.constant 0 : index
    %0 = vector.load %arg1[%c0, %c0_0] : memref<8x32xf32, #tpu.memory_space<vmem>>, vector<8x32xf32>
    %1 = arith.mulf %0, %0 : vector<8x32xf32>
    %cst = arith.constant dense<0.000000e+00> : vector<8xf32>
    %2 = vector.multi_reduction <add>, %1, %cst [1] : vector<8x32xf32> to vector<8xf32>
    %3 = vector.shape_cast %2 : vector<8xf32> to vector<8x1xf32>
    %cst_1 = arith.constant 3.200000e+01 : f32
    %4 = vector.broadcast %cst_1 : f32 to vector<8x1xf32>
    %5 = arith.divf %3, %4 : vector<8x1xf32>
    %6 = math.sqrt %5 : vector<8x1xf32>
    %cst_2 = arith.constant 9.99999974E-6 : f32
    %7 = vector.broadcast %cst_2 : f32 to vector<8x1xf32>
    %8 = arith.addf %6, %7 : vector<8x1xf32>
    %9 = tpu.reciprocal %8 : vector<8x1xf32> -> vector<8x1xf32>
    %10 = vector.broadcast %9 : vector<8x1xf32> to vector<8x32xf32>
    %11 = arith.mulf %0, %10 : vector<8x32xf32>
    %c0_3 = arith.constant 0 : index
    %c0_4 = arith.constant 0 : index
    %12 = vector.load %arg2[%c0_3, %c0_4] : memref<1x32xf32, #tpu.memory_space<vmem>>, vector<1x32xf32>
    %13 = vector.broadcast %12 : vector<1x32xf32> to vector<8x32xf32>
    %14 = arith.mulf %11, %13 : vector<8x32xf32>
    %c0_5 = arith.constant 0 : index
    %c0_6 = arith.constant 0 : index
    %15 = vector.load %arg3[%c0_5, %c0_6] : memref<8x32xf32, #tpu.memory_space<vmem>>, vector<8x32xf32>
    tpu.vector_store %arg3[%c0_5, %c0_6], %14 {strides = array<i32>} : memref<8x32xf32, #tpu.memory_space<vmem>>, vector<8x32xf32>,
    return
  }
  func.func @transform_0(%arg0: i32) -> (i32, i32) {
    %c0_i32 = arith.constant 0 : i32
    %c0_i32_0 = arith.constant 0 : i32
    return %arg0, %c0_i32 : i32, i32
  }
  func.func @transform_1(%arg0: i32) -> (i32, i32) {
    %c0_i32 = arith.constant 0 : i32
    %c0_i32_0 = arith.constant 0 : i32
    %c0_i32_1 = arith.constant 0 : i32
    return %c0_i32, %c0_i32_0 : i32, i32
  }
  func.func @transform_2(%arg0: i32) -> (i32, i32) {
    %c0_i32 = arith.constant 0 : i32
    %c0_i32_0 = arith.constant 0 : i32
    return %arg0, %c0_i32 : i32, i32
  }
}

</mosaic_0001>

<bundles_post_ra>
// kernel: tpu_custom_call.1
= control target key start
LH: loop header
LB: loop body
LE: loop exit
PB: predicated region body
PF: predicated region fallthrough
CT: control target
= control target key end

     0   :  { %7 = vsyncpa [#allocation3], 0  ;;  %s692_s0 = inlined_call_operand.hbm [shape: f32[16,32], index: 0, kind: input, shape index: {}]   ;;  %s693_s1 = inlined_call_operand.hbm [shape: f32[1,32], index: 1, kind: input, shape index: {}]   ;;  %s694_s2 = inlined_call_operand.hbm [shape: f32[16,32], index: 2, kind: output, shape index: {}]  }
   0x1   :  { %9 = vsyncpa [#allocation3 + $0x1], 0 }
   0x2   :  { %10 = vsyncpa [#allocation6], 0 }
   0x3   :  { %11 = vsyncpa [#allocation4], 0 }
   0x4   :  { %13 = vsyncpa [#allocation4 + $0x1], 0  ;;  %s548_s9 = smov 0   ;;  %s550_s10 = smov 0  }
   0x5   :  { %s552_s11 = smov 0   ;;  %s554_s12 = smov 0  }
   0x6 LB: > { %s569_s13 = sadd.s32 4294967295, %s529_s12   ;;  %s320_s14 = sadd.s32 4294967294, %s529_s12   ;;  %s529_s12 = sphi %s554_s12, %s704_s12   ;;  %s525_s11 = sphi %s552_s11, %s703_s11   ;;  %s521_s10 = sphi %s550_s10, %s702_s10   ;;  %s517_s9 = sphi %s548_s9, %s701_s9  }
   0x7   : > { %p39_p0 = scmp.ne.s32.totalorder %s521_s10, %s517_s9  ;;  %p40_p1 = scmp.eq.s32.totalorder %s569_s13, 0 }
   0x8   : > { %p84_p2 = scmp.eq.s32.totalorder %s569_s13, 1  ;;  %p90_p3 = scmp.eq.s32.totalorder %s320_s14, 1 }
   0x9   : > { %p578_p4 = por %p40_p1, %p39_p0  ;;  %p321_p5 = scmp.ge.s32.totalorder %s529_s12, 1 }
   0xa   : > { %p583_p6 = por %p90_p3, %p39_p0  ;;  %p97_p7 = scmp.lt.s32.totalorder %s529_s12, 3 }
   0xb   : > { %s109_s19 = sshll.u32 %s693_s1, 4  ;;  %s531_s21 = smov [#allocation5]   ;;  %s110_s19 = int_to_ptr.hbm [resolvable:$true] %s109_s19 }
   0xc   : > { %p591_p8 = pnand %p321_p5, %p97_p7  ;;  %s111_s22 = sshll.u32 %s531_s21, 4  ;;  %s112_s22 = int_to_ptr.vmem [resolvable:$true] %s111_s22 }
   0xd   : > { %s601_s23 = sadd.s32 1, %s529_s12   ;;  %s26_s24 = sadd.s32 1, %s525_s11 }
   0xe   : > { %p342_p10 = pneg %p591_p8  ;;  %s23_s25 = ssub.s32 %s529_s12, %s601_s23 }
   0xf   : > { %p24_p12 = scmp.eq.s32.totalorder %s23_s25, 0  ;;  %p33_p13 = scmp.ne.s32.totalorder %s525_s11, %s521_s10 }
  0x10   : > { %p343_p11 = pnand %p342_p10, %p40_p1  ;;  %p34_p0 = scmp.eq.s32.totalorder %s529_s12, 0 }
  0x11   : > { %s610_s26 = scalar_select %p24_p12, %s525_s11, %s26_s24  }
  0x12   : > { %345 = dma.hbm_to_vmem [thread:$0]  (!%p343_p11), %s110_s19, 16, %s112_s22, [#allocation6]  }
  0x13   : > { %p614_p3 = por %p84_p2, %p33_p13  ;;  %p355_p5 = scmp.lt.s32.totalorder %s529_s12, 2 }
  0x14   : > { %s122_s28 = sand.u32 1, %s525_s11   ;;  %s325_s29 = sshll.u32 %s529_s12, 3 }
  0x15   : > { %p35_p7 = por %p34_p0, %p33_p13  ;;  %s324_s30 = sshll.u32 %s122_s28, 3 }
  0x16   : > { %s130_s5 = scalar_lea.hbm %s692_s0, %s325_s29  ;;  %s126_s7 = scalar_lea.vmem [#allocation2], %s324_s30 }
  0x17   : > { %s132_s6 = sshll.u32 %s130_s5, 4  ;;  %s134_s8 = sshll.u32 %s126_s7, 4  ;;  %s133_s6 = int_to_ptr.hbm [resolvable:$true] %s132_s6  ;;  %s135_s8 = int_to_ptr.vmem [resolvable:$true] %s134_s8 }
  0x18   : > { %p624_p10 = pnand %p355_p5, %p35_p7  ;;  %s123_s17 = scalar_lea.sflag [#allocation3], %s122_s28 }
  0x19   : > { %s429_s18 = sshra.s32 %s133_s6, 4  ;;  %s436_s24 = scalar_lea.hbm %s692_s0, 16  ;;  %s430_s18 = int_to_ptr.hbm [resolvable:$true] %s429_s18 }
  0x1a   : > { %s431_s19 = scalar_lea.hbm %s430_s18, 8  ;;  %p433_p11 = pneg %p624_p10 }
  0x1b   : > { %p432_p2 = scmp.ne.s32.totalorder %s430_s18, %s431_s19  ;;  %p437_p0 = scmp.lt.s32.totalorder %s430_s18, %s692_s0 }
  0x1c   : > { %p438_p5 = scmp.lt.s32.totalorder %s436_s24, %s431_s19 }
  0x1d   : > { %p434_p12 = pnand %p433_p11, %p432_p2 }
  0x1e   : > { %p439_p7 = por %p438_p5, %p437_p0 }
  0x1f   : > { %p435_p13 = pneg %p434_p12 }
  0x21   : > { %p440_p9 = pnand %p439_p7, %p435_p13 }
  0x23   : > { %443 = shalt.err (!%p440_p9)
}
  0x24   : > { %349 = dma.hbm_to_vmem [thread:$0]  (!%p624_p10), %s133_s6, 128, %s135_s8, %s123_s17  }
  0x25   : > { %143 = sbr.rel (%p591_p8) target bundleno = 214 (0xd6), region = 28  ;;  %s641_s28 = sand.u32 (!%p591_p8), 1, %s521_s10  }
  0x26   : > { %s327_s30 = sshll.u32 (!%p591_p8), %s641_s28, 3  ;;  %s146_s3 = scalar_lea.sflag (!%p591_p8), [#allocation3], %s641_s28 }
  0x27   : > { %s149_s4 = scalar_lea.vmem (!%p591_p8), [#allocation2], %s327_s30 }
  0x2a   : > { %504 = dma.done.wait (%p578_p4), %s146_s3, 128  }
  0x2b   : > { %506 = vsyncadd (%p578_p4), %s146_s3, 4294967168 }
  0x2c   : > { %508 = dma.done.wait (%p40_p1), [#allocation6], 16  }
  0x2d   : > { %510 = vsyncadd (%p40_p1), [#allocation6], 4294967280  ;;  %v176_v0 = vld [vmem:[%s149_s4] sm:$0xff]  ;;  %vm178_vm0 = vcmask 261120   ;;  %v532_v3 = vmov 32.0   ;;  %s331_s15 = sshll.u32 %s569_s13, 3 }
  0x2e   : > { %v177_v1 = vmul.f32 %v176_v0, %v176_v0  ;;  %393 = vrcp.f32 %v532_v3  ;;  %s235_s6 = scalar_lea.hbm %s694_s2, %s331_s15  ;;  %v392_v32 = vld [vmem:[#allocation5] ss:$0 sm:$0xff]  ;;  %s175_s7 = scalar_lea.vmem [#allocation7], %s327_s30 }
  0x2f   : > { %s237_s13 = sshll.u32 %s175_s7, 4  ;;  %s239_s8 = sshll.u32 %s235_s6, 4  ;;  %s238_s13 = int_to_ptr.vmem [resolvable:$true] %s237_s13  ;;  %s240_s8 = int_to_ptr.hbm [resolvable:$true] %s239_s8 }
  0x30   : > { %v179_v2 = vsel %vm178_vm0, %v177_v1, 0.0  ;;  %s225_s14 = scalar_lea.sflag [#allocation4], %s641_s28  ;;  %s473_s17 = sshra.s32 %s240_s8, 4  ;;  %s474_s17 = int_to_ptr.hbm [resolvable:$true] %s473_s17 }
  0x31   : > { %180 = vadd.xlane.f32.xlu0 %v179_v2  ;;  %s475_s18 = scalar_lea.hbm %s474_s17, 8  ;;  %s479_s22 = scalar_lea.hbm %s694_s2, 16 }
  0x32   : > { %p476_p1 = scmp.ne.s32.totalorder %s474_s17, %s475_s18  ;;  %p480_p9 = scmp.lt.s32.totalorder %s474_s17, %s694_s2 }
  0x33   : > { %p481_p10 = scmp.lt.s32.totalorder %s479_s22, %s475_s18 }
  0x34   : > { %v394_v4 = vpop.eup %393  ;;  %p477_p4 = pnand %p476_p1, %p614_p3 }
  0x35   : > { %v183_v5 = vmul.f32 32.0, %v394_v4  ;;  %vm187_vm1 = vweird.f32 %v394_v4  ;;  %p482_p2 = por %p481_p10, %p480_p9 }
  0x36   : > { %p478_p8 = pneg %p477_p4 }
  0x37   : > { %v184_v6 = vsub.f32 1.0, %v183_v5 }
  0x38   : > { %p483_p11 = pnand %p482_p2, %p478_p8 }
  0x39   : > { %v185_v7 = vmul.f32 %v394_v4, %v184_v6 }
  0x3b   : > { %v186_v8 = vadd.f32 %v394_v4, %v185_v7 }
  0x3d   : > { %v188_v9 = vsel %vm187_vm1, %v394_v4, %v186_v8 }
  0xa4   : > { %v181_v10 = vpop.xlane.xlu0 %180 }
  0xa5   : > { %v189_v11 = vmul.f32 %v188_v9, %v181_v10 }
  0xa7   : > { %395 = vrsqrt.f32 %v189_v11  ;;  %vm197_vm2 = vcmp.eq.f32.partialorder %v189_v11, inf  ;;  %v200_v19 = vand.u32 2147483648, %v189_v11  ;;  %vm199_vm3 = vcmp.eq.f32.partialorder %v189_v11, 0.0 }
  0xad   : > { %v396_v12 = vpop.eup %395 }
  0xae   : > { %v191_v13 = vmul.f32 %v396_v12, %v189_v11 }
  0xb0   : > { %v192_v14 = vmul.f32 %v396_v12, %v191_v13 }
  0xb2   : > { %v193_v15 = vmul.f32 0.5, %v192_v14 }
  0xb4   : > { %v194_v16 = vsub.f32 1.5, %v193_v15 }
  0xb6   : > { %v195_v17 = vmul.f32 %v396_v12, %v194_v16 }
  0xb8   : > { %v196_v18 = vmul.f32 %v195_v17, %v189_v11 }
  0xba   : > { %v198_v20 = vsel %vm197_vm2, %v189_v11, %v196_v18 }
  0xbb   : > { %v201_v21 = vsel %vm199_vm3, %v200_v19, %v198_v20 }
  0xbc   : > { %v202_v22 = vadd.f32 1e-05, %v201_v21 }
  0xbe   : > { %397 = vrcp.f32 %v202_v22  ;;  %v214_v26 = vand.u32 2147483648, %v202_v22  ;;  %v212_v28 = vand.u32 2147483647, %v202_v22  ;;  %vm208_vm5 = vweird.f32 %v202_v22 }
  0xc0   : > { %v215_v30 = vor.u32 1.1754944e-38, %v214_v26  ;;  %vm213_vm7 = vcmp.eq.f32.partialorder %v212_v28, 8.507059e+37 }
  0xc4   : > { %v398_v23 = vpop.eup %397 }
  0xc5   : > { %v204_v24 = vmul.f32 %v398_v23, %v202_v22  ;;  %vm209_vm4 = vweird.f32 %v398_v23 }
  0xc6   : > { %vm210_vm6 = vmor %vm208_vm5, %vm209_vm4 }
  0xc7   : > { %v205_v25 = vsub.f32 1.0, %v204_v24 }
  0xc9   : > { %v206_v27 = vmul.f32 %v398_v23, %v205_v25 }
  0xcb   : > { %v207_v29 = vadd.f32 %v398_v23, %v206_v27 }
  0xcd   : > { %v211_v31 = vsel %vm210_vm6, %v398_v23, %v207_v29 }
  0xce   : > { %v216_v33 = vsel %vm213_vm7, %v215_v30, %v211_v31 }
  0xcf   : > { %v217_v34 = vmul.f32 %v216_v33, %v176_v0 }
  0xd1   : > { %v222_v35 = vmul.f32 %v392_v32, %v217_v34 }
  0xd3   : > { %223 = vst.msk [vmem:[%s175_s7] sm:$0xff] %vm178_vm0, %v222_v35 }
  0xd4   : > { %486 = shalt.err (!%p483_p11)
}
  0xd5   : > { %340 = dma.vmem_to_hbm [thread:$0]  (%p614_p3), %s238_s13, 128, %s240_s8, %s225_s14  }
  0xd6 PF: > { %s251_s29 = sand.u32 1, %s517_s9   ;;  %p700_p12 = scmp.ge.s32.totalorder %s529_s12, 2 }
  0xd7   : > { %s252_s28 = scalar_lea.sflag [#allocation4], %s251_s29 }
  0xd8   : > { %p351_p13 = pnand %p700_p12, %p583_p6 }
  0xda   : > { %p352_p0 = pneg %p351_p13 }
  0xdc   : > { %512 = dma.done.wait (%p352_p0), %s252_s28, 128  }
  0xdd   : > { %514 = vsyncadd (%p352_p0), %s252_s28, 4294967168  ;;  %p16_p5 = scmp.ge.s32.totalorder %s601_s23, 4   ;;  %s701_s9 = smov %s521_s10 }
  0xde   : > { %s702_s10 = smov %s525_s11  ;;  %s703_s11 = smov %s610_s26 }
  0xdf   : > { %s704_s12 = smov %s601_s23  ;;  %18 = sbr.rel (!%p16_p5) target bundleno = 6 (0x6), region = 77 }
  0xe4   :  { %258 = vsyncpa [#allocation3], 1 }
  0xe5   :  { %260 = vsyncpa [#allocation3 + $0x1], 1 }
  0xe6   :  { %261 = vsyncpa [#allocation6], 1 }
  0xe7   :  { %262 = vsyncpa [#allocation4], 1 }
  0xe8   :  { %264 = vsyncpa [#allocation4 + $0x1], 1 }

</bundles_post_ra>
